<compile_context>
chip_gen: v7x
topology: tpu7x:2x2x1
jax: 0.10.0
libtpu: 0.0.40
codegen_flags: <defaults>
</compile_context>

<pallas_src>
import functools

import jax
import jax.numpy as jnp
from jax.experimental import pallas as pl
from jax.experimental.pallas import tpu as pltpu


# ---------------------------------------------------------------------------
# Kernel 1: margin-adjust + scale the (N, C) logits.
# 2-D grid over (row tiles, class tiles); no cross-step state, both axes
# "parallel" so the HBM-bound streaming pass can shard across megacore TCs.
# ---------------------------------------------------------------------------
def _magface_logits_kernel(logits_ref, labels_ref, emb_ref, out_ref, *,
                           s, l_a, u_a, l_margin, u_margin, tile_c):
    j = pl.program_id(1)                                     # class-tile index

    logits = logits_ref[...].astype(jnp.float32)             # (TN, TC)
    labels = labels_ref[...]                                  # (TN, 1) int32
    emb = emb_ref[...].astype(jnp.float32)                    # (TN, D)

    valid = labels != -1                                      # (TN, 1)

    # Per-row magnitude / adaptive margin.  D is tiny, so recomputing this per
    # class tile is cheaper than extra scratch state; the embeddings / labels
    # blocks have a constant block index along j so their DMA only fires when
    # the row tile changes.
    x_norm = jnp.sqrt(jnp.sum(emb * emb, axis=-1, keepdims=True))   # (TN, 1)
    x_norm = jnp.clip(x_norm, l_a, u_a)
    ada_margin = (u_margin - l_margin) / (u_a - l_a) * (x_norm - l_a) + l_margin
    cos_m = jnp.cos(ada_margin)                               # (TN, 1)
    sin_m = jnp.sin(ada_margin)                               # (TN, 1)

    tn, tc = logits.shape
    col_ids = jax.lax.broadcasted_iota(jnp.int32, (tn, tc), 1) + j * tile_c
    onehot = (col_ids == labels) & valid                      # (TN, TC)

    # Gather the target logit for this class tile.  If the label falls outside
    # this tile, `onehot` is all-false for the row: the gathered value is 0
    # but `new_target` is never selected, so the row is just scaled by s.
    target_logit = jnp.sum(jnp.where(onehot, logits, 0.0), axis=-1, keepdims=True)
    sin_theta = jnp.sqrt(1.0 - target_logit * target_logit)   # matches torch (no clamp)
    new_target = target_logit * cos_m - sin_theta * sin_m     # (TN, 1)

    out = jnp.where(onehot, new_target, logits) * s
    out_ref[...] = out.astype(out_ref.dtype)


# ---------------------------------------------------------------------------
# Kernel 2: MagFace regularizer g(x_norm) mean over valid rows.
# Embeddings-only (N x D, tiny), sequential accumulator grid, (1,1) VMEM
# accumulators (pure vector ops — robust lowering, no SMEM float stores).
# ---------------------------------------------------------------------------
def _magface_loss_kernel(emb_ref, labels_ref, loss_ref, gsum_ref, cnt_ref, *,
                         l_a, u_a):
    i = pl.program_id(0)

    @pl.when(i == 0)
    def _():
        gsum_ref[...] = jnp.zeros_like(gsum_ref)
        cnt_ref[...] = jnp.zeros_like(cnt_ref)

    emb = emb_ref[...].astype(jnp.float32)                    # (TN, D)
    labels = labels_ref[...]                                   # (TN, 1) int32
    valid = (labels != -1).astype(jnp.float32)                 # (TN, 1)

    x_norm = jnp.sqrt(jnp.sum(emb * emb, axis=-1, keepdims=True))
    x_norm = jnp.clip(x_norm, l_a, u_a)
    # Exact divide (not approx reciprocal) so the loss bit-matches the
    # reference; per-row op on a tiny array, perf-irrelevant.
    g = x_norm * (1.0 / (u_a * u_a)) + 1.0 / x_norm            # (TN, 1)

    gsum_ref[...] += jnp.sum(g * valid, keepdims=True)
    cnt_ref[...] += jnp.sum(valid, keepdims=True)

    @pl.when(i == pl.num_programs(0) - 1)
    def _():
        loss_ref[...] = gsum_ref[...] / cnt_ref[...]


def magface_forward(logits, labels, embeddings, *,
                    s=64.0, l_a=10.0, u_a=110.0, l_margin=0.45, u_margin=0.8,
                    tn=512, tile_c=4096, donate_logits=True):
    n, c = logits.shape
    d = embeddings.shape[1]

    tn = min(tn, n)
    tile_c = min(tile_c, c)
    assert n % tn == 0 and (tn % 8 == 0 or tn == n), "bad row tile"
    assert c % tile_c == 0 and (tile_c % 128 == 0 or tile_c == c), "bad class tile"

    labels2d = labels.reshape(n, 1).astype(jnp.int32)
    itemsize = jnp.dtype(logits.dtype).itemsize
    d_pad = max(((d + 127) // 128) * 128, 128)

    # Double-buffered in + out logits tiles dominate VMEM; budget the scoped
    # limit for them plus the small label/embedding blocks and headroom.
    est = (4 * tn * tile_c * itemsize      # logits in + out, double-buffered
           + 2 * tn * 128 * 4              # labels (lane-padded)
           + 2 * tn * d_pad * 4)           # embeddings
    vmem_limit = int(min(max(est + (8 << 20), 32 << 20), 100 << 20))

    logits_kernel = functools.partial(
        _magface_logits_kernel, s=s, l_a=l_a, u_a=u_a,
        l_margin=l_margin, u_margin=u_margin, tile_c=tile_c)

    out_logits = pl.pallas_call(
        logits_kernel,
        out_shape=jax.ShapeDtypeStruct((n, c), logits.dtype),
        grid_spec=pltpu.PrefetchScalarGridSpec(
            num_scalar_prefetch=0,
            grid=(n // tn, c // tile_c),
            in_specs=[
                pl.BlockSpec((tn, tile_c), lambda i, j: (i, j)),
                pl.BlockSpec((tn, 1), lambda i, j: (i, 0)),
                pl.BlockSpec((tn, d), lambda i, j: (i, 0)),
            ],
            out_specs=pl.BlockSpec((tn, tile_c), lambda i, j: (i, j)),
        ),
        compiler_params=pltpu.CompilerParams(
            dimension_semantics=("parallel", "parallel"),
            vmem_limit_bytes=vmem_limit),
        input_output_aliases=({0: 0} if donate_logits else {}),
    )(logits, labels2d, embeddings)

    # --- regularizer loss over embeddings only (tiny, sequential grid) ---
    tn_e = min(512, n)
    assert n % tn_e == 0
    loss_kernel = functools.partial(_magface_loss_kernel, l_a=l_a, u_a=u_a)
    loss = pl.pallas_call(
        loss_kernel,
        out_shape=jax.ShapeDtypeStruct((1, 1), jnp.float32),
        grid_spec=pltpu.PrefetchScalarGridSpec(
            num_scalar_prefetch=0,
            grid=(n // tn_e,),
            in_specs=[
                pl.BlockSpec((tn_e, d), lambda i: (i, 0)),
                pl.BlockSpec((tn_e, 1), lambda i: (i, 0)),
            ],
            out_specs=pl.BlockSpec((1, 1), lambda i: (0, 0)),
            scratch_shapes=[pltpu.VMEM((1, 1), jnp.float32),
                            pltpu.VMEM((1, 1), jnp.float32)],
        ),
        compiler_params=pltpu.CompilerParams(
            dimension_semantics=("arbitrary",)),
    )(embeddings, labels2d)

    return out_logits, loss[0, 0]


def magface_reference(logits, labels, embeddings, *,
                      s=64.0, l_a=10.0, u_a=110.0, l_margin=0.45, u_margin=0.8):
    n, c = logits.shape
    valid = labels != -1
    x_norm = jnp.clip(
        jnp.sqrt(jnp.sum(embeddings.astype(jnp.float32) ** 2, axis=1, keepdims=True)),
        l_a, u_a)
    margin = (u_margin - l_margin) / (u_a - l_a) * (x_norm - l_a) + l_margin
    cos_m = jnp.cos(margin)
    sin_m = jnp.sin(margin)
    onehot = (labels[:, None] == jnp.arange(c)[None, :]) & valid[:, None]
    target = jnp.sum(jnp.where(onehot, logits, 0.0), axis=1, keepdims=True)
    sin_theta = jnp.sqrt(1.0 - target ** 2)
    new_target = target * cos_m - sin_theta * sin_m
    out = (jnp.where(onehot, new_target, logits) * s).astype(logits.dtype)
    g = x_norm / (u_a ** 2) + 1.0 / x_norm
    loss_g = jnp.sum(jnp.where(valid[:, None], g, 0.0)) / jnp.sum(valid)
    return out, loss_g


if __name__ == "__main__":
    key = jax.random.PRNGKey(0)
    k1, k2, k3 = jax.random.split(key, 3)

    N, C, D = 16, 256, 32  # batch, num classes, embedding dim (small demo)

    # cosine-like logits in (-0.9, 0.9) so sqrt(1 - t^2) is well defined
    logits = jax.random.uniform(k1, (N, C), jnp.float32, minval=-0.9, maxval=0.9)
    # embeddings scaled so norms land inside [l_a, u_a]
    embeddings = 10.0 * jax.random.normal(k2, (N, D), jnp.float32)
    labels = jax.random.randint(k3, (N,), 0, C, dtype=jnp.int32)
    labels = labels.at[3].set(-1).at[11].set(-1)  # a couple of ignored samples

    # Compute the reference FIRST: the kernel aliases/donates the logits
    # buffer (mirrors the torch module's in-place mutation of `logits`).
    ref_logits, ref_loss = magface_reference(logits, labels, embeddings)
    ref_logits = jax.block_until_ready(ref_logits)
    ref_loss = jax.block_until_ready(ref_loss)

    # Small tiles here purely to exercise the 2-D (row x class) grid path;
    # production defaults are tn=512, tile_c=4096.
    fwd = jax.jit(functools.partial(magface_forward, tn=8, tile_c=128),
                  donate_argnums=0)
    out_logits, loss_g = fwd(logits, labels, embeddings)
    out_logits = jax.block_until_ready(out_logits)
    loss_g = jax.block_until_ready(loss_g)

    assert jnp.allclose(out_logits, ref_logits, atol=1e-4, rtol=1e-4), "logits mismatch"
    assert jnp.allclose(loss_g, ref_loss, atol=1e-5, rtol=1e-5), "loss_g mismatch"

    print("KERNEL_OK")
</pallas_src>

<mosaic_0001>
module attributes {stable_mosaic.version = 11 : i64} {
  func.func @_magface_logits_kernel(%arg0: i32, %arg1: i32, %arg2: memref<8x128xf32, #tpu.memory_space<vmem>>, %arg3: memref<8x1xi32, #tpu.memory_space<vmem>>, %arg4: memref<8x32xf32, #tpu.memory_space<vmem>>, %arg5: memref<8x128xf32, #tpu.memory_space<vmem>>) attributes {dimension_semantics = [#tpu.dimension_semantics<parallel>, #tpu.dimension_semantics<parallel>], iteration_bounds = array<i64: 2, 2>, scalar_prefetch = 0 : i64, scratch_operands = 0 : i64, tpu.core_type = #tpu.core_type<tc>, window_params = [{transform_indices = @transform_0, window_bounds = array<i64: 8, 128>}, {transform_indices = @transform_1, window_bounds = array<i64: 8, 1>}, {transform_indices = @transform_2, window_bounds = array<i64: 8, 32>}, {transform_indices = @transform_3, window_bounds = array<i64: 8, 128>}]} {
    %c0 = arith.constant 0 : index
    %c0_0 = arith.constant 0 : index
    %0 = vector.load %arg2[%c0, %c0_0] : memref<8x128xf32, #tpu.memory_space<vmem>>, vector<8x128xf32>
    %c0_1 = arith.constant 0 : index
    %c0_2 = arith.constant 0 : index
    %1 = vector.load %arg3[%c0_1, %c0_2] : memref<8x1xi32, #tpu.memory_space<vmem>>, vector<8x1xi32>
    %c0_3 = arith.constant 0 : index
    %c0_4 = arith.constant 0 : index
    %2 = vector.load %arg4[%c0_3, %c0_4] : memref<8x32xf32, #tpu.memory_space<vmem>>, vector<8x32xf32>
    %c-1_i32 = arith.constant -1 : i32
    %3 = vector.broadcast %c-1_i32 : i32 to vector<8x1xi32>
    %4 = arith.cmpi ne, %1, %3 : vector<8x1xi32>
    %5 = arith.mulf %2, %2 : vector<8x32xf32>
    %cst = arith.constant dense<0.000000e+00> : vector<8xf32>
    %6 = vector.multi_reduction <add>, %5, %cst [1] : vector<8x32xf32> to vector<8xf32>
    %7 = vector.shape_cast %6 : vector<8xf32> to vector<8x1xf32>
    %8 = math.sqrt %7 : vector<8x1xf32>
    %cst_5 = arith.constant 1.000000e+01 : f32
    %cst_6 = arith.constant 1.100000e+02 : f32
    %9 = vector.broadcast %cst_5 : f32 to vector<8x1xf32>
    %10 = arith.maximumf %9, %8 : vector<8x1xf32>
    %11 = vector.broadcast %cst_6 : f32 to vector<8x1xf32>
    %12 = arith.minimumf %11, %10 : vector<8x1xf32>
    %cst_7 = arith.constant 1.000000e+01 : f32
    %13 = vector.broadcast %cst_7 : f32 to vector<8x1xf32>
    %14 = arith.subf %12, %13 : vector<8x1xf32>
    %cst_8 = arith.constant 3.500000e-03 : f32
    %15 = vector.broadcast %cst_8 : f32 to vector<8x1xf32>
    %16 = arith.mulf %15, %14 : vector<8x1xf32>
    %cst_9 = arith.constant 4.500000e-01 : f32
    %17 = vector.broadcast %cst_9 : f32 to vector<8x1xf32>
    %18 = arith.addf %16, %17 : vector<8x1xf32>
    %19 = math.cos %18 : vector<8x1xf32>
    %20 = math.sin %18 : vector<8x1xf32>
    %21 = tpu.iota {dimensions = array<i32: 1>} : vector<8x128xi32>
    %c128_i32 = arith.constant 128 : i32
    %22 = arith.muli %arg1, %c128_i32 : i32
    %23 = vector.broadcast %22 : i32 to vector<8x128xi32>
    %24 = arith.addi %21, %23 : vector<8x128xi32>
    %25 = vector.broadcast %1 : vector<8x1xi32> to vector<8x128xi32>
    %26 = arith.cmpi eq, %24, %25 : vector<8x128xi32>
    %27 = vector.broadcast %4 : vector<8x1xi1> to vector<8x128xi1>
    %28 = arith.andi %26, %27 : vector<8x128xi1>
    %cst_10 = arith.constant 0.000000e+00 : f32
    %29 = vector.broadcast %cst_10 : f32 to vector<8x128xf32>
    %30 = arith.select %28, %0, %29 : vector<8x128xi1>, vector<8x128xf32>
    %cst_11 = arith.constant dense<0.000000e+00> : vector<8xf32>
    %31 = vector.multi_reduction <add>, %30, %cst_11 [1] : vector<8x128xf32> to vector<8xf32>
    %32 = vector.shape_cast %31 : vector<8xf32> to vector<8x1xf32>
    %33 = arith.mulf %32, %32 : vector<8x1xf32>
    %cst_12 = arith.constant 1.000000e+00 : f32
    %34 = vector.broadcast %cst_12 : f32 to vector<8x1xf32>
    %35 = arith.subf %34, %33 : vector<8x1xf32>
    %36 = math.sqrt %35 : vector<8x1xf32>
    %37 = arith.mulf %32, %19 : vector<8x1xf32>
    %38 = arith.mulf %36, %20 : vector<8x1xf32>
    %39 = arith.subf %37, %38 : vector<8x1xf32>
    %40 = vector.shape_cast %39 : vector<8x1xf32> to vector<8x1xf32>
    %41 = vector.broadcast %40 : vector<8x1xf32> to vector<8x128xf32>
    %42 = arith.select %28, %41, %0 : vector<8x128xi1>, vector<8x128xf32>
    %cst_13 = arith.constant 6.400000e+01 : f32
    %43 = vector.broadcast %cst_13 : f32 to vector<8x128xf32>
    %44 = arith.mulf %42, %43 : vector<8x128xf32>
    %c0_14 = arith.constant 0 : index
    %c0_15 = arith.constant 0 : index
    %45 = vector.load %arg5[%c0_14, %c0_15] : memref<8x128xf32, #tpu.memory_space<vmem>>, vector<8x128xf32>
    tpu.vector_store %arg5[%c0_14, %c0_15], %44 {strides = array<i32>} : memref<8x128xf32, #tpu.memory_space<vmem>>, vector<8x128xf32>,
    return
  }
  func.func @transform_0(%arg0: i32, %arg1: i32) -> (i32, i32) {
    %c0_i32 = arith.constant 0 : i32
    return %arg0, %arg1 : i32, i32
  }
  func.func @transform_1(%arg0: i32, %arg1: i32) -> (i32, i32) {
    %c0_i32 = arith.constant 0 : i32
    %c0_i32_0 = arith.constant 0 : i32
    return %arg0, %c0_i32 : i32, i32
  }
  func.func @transform_2(%arg0: i32, %arg1: i32) -> (i32, i32) {
    %c0_i32 = arith.constant 0 : i32
    %c0_i32_0 = arith.constant 0 : i32
    return %arg0, %c0_i32 : i32, i32
  }
  func.func @transform_3(%arg0: i32, %arg1: i32) -> (i32, i32) {
    %c0_i32 = arith.constant 0 : i32
    return %arg0, %arg1 : i32, i32
  }
}

module attributes {stable_mosaic.version = 11 : i64} {
  func.func @_magface_loss_kernel(%arg0: i32, %arg1: memref<16x32xf32, #tpu.memory_space<vmem>>, %arg2: memref<16x1xi32, #tpu.memory_space<vmem>>, %arg3: memref<1x1xf32, #tpu.memory_space<vmem>>, %arg4: memref<1x1xf32, #tpu.memory_space<vmem>>, %arg5: memref<1x1xf32, #tpu.memory_space<vmem>>) attributes {dimension_semantics = [#tpu.dimension_semantics<arbitrary>], iteration_bounds = array<i64: 1>, scalar_prefetch = 0 : i64, scratch_operands = 2 : i64, tpu.core_type = #tpu.core_type<tc>, window_params = [{transform_indices = @transform_0, window_bounds = array<i64: 16, 32>}, {transform_indices = @transform_1, window_bounds = array<i64: 16, 1>}, {pipeline_mode = #tpu.pipeline_mode<synchronous>, transform_indices = @transform_2, window_bounds = array<i64: 1, 1>}]} {
    %c0_i32 = arith.constant 0 : i32
    %0 = arith.cmpi eq, %arg0, %c0_i32 : i32
    %1 = arith.extui %0 : i1 to i32
    %c0_i32_0 = arith.constant 0 : i32
    %2 = arith.cmpi ne, %1, %c0_i32_0 : i32
    scf.if %2 {
      %cst_20 = arith.constant 0.000000e+00 : f32
      %42 = vector.broadcast %cst_20 : f32 to vector<1x1xf32>
      %c0_21 = arith.constant 0 : index
      %c0_22 = arith.constant 0 : index
      %43 = vector.load %arg4[%c0_21, %c0_22] : memref<1x1xf32, #tpu.memory_space<vmem>>, vector<1x1xf32>
      tpu.vector_store %arg4[%c0_21, %c0_22], %42 {strides = array<i32>} : memref<1x1xf32, #tpu.memory_space<vmem>>, vector<1x1xf32>,
      %cst_23 = arith.constant 0.000000e+00 : f32
      %44 = vector.broadcast %cst_23 : f32 to vector<1x1xf32>
      %c0_24 = arith.constant 0 : index
      %c0_25 = arith.constant 0 : index
      %45 = vector.load %arg5[%c0_24, %c0_25] : memref<1x1xf32, #tpu.memory_space<vmem>>, vector<1x1xf32>
      tpu.vector_store %arg5[%c0_24, %c0_25], %44 {strides = array<i32>} : memref<1x1xf32, #tpu.memory_space<vmem>>, vector<1x1xf32>,
    } else {
    }
    %c0 = arith.constant 0 : index
    %c0_1 = arith.constant 0 : index
    %3 = vector.load %arg1[%c0, %c0_1] : memref<16x32xf32, #tpu.memory_space<vmem>>, vector<16x32xf32>
    %c0_2 = arith.constant 0 : index
    %c0_3 = arith.constant 0 : index
    %4 = vector.load %arg2[%c0_2, %c0_3] : memref<16x1xi32, #tpu.memory_space<vmem>>, vector<16x1xi32>
    %c-1_i32 = arith.constant -1 : i32
    %5 = vector.broadcast %c-1_i32 : i32 to vector<16x1xi32>
    %6 = arith.cmpi ne, %4, %5 : vector<16x1xi32>
    %7 = arith.extui %6 : vector<16x1xi1> to vector<16x1xi32>
    %8 = arith.sitofp %7 : vector<16x1xi32> to vector<16x1xf32>
    %9 = arith.mulf %3, %3 : vector<16x32xf32>
    %cst = arith.constant dense<0.000000e+00> : vector<16xf32>
    %10 = vector.multi_reduction <add>, %9, %cst [1] : vector<16x32xf32> to vector<16xf32>
    %11 = vector.shape_cast %10 : vector<16xf32> to vector<16x1xf32>
    %12 = math.sqrt %11 : vector<16x1xf32>
    %cst_4 = arith.constant 1.000000e+01 : f32
    %cst_5 = arith.constant 1.100000e+02 : f32
    %13 = vector.broadcast %cst_4 : f32 to vector<16x1xf32>
    %14 = arith.maximumf %13, %12 : vector<16x1xf32>
    %15 = vector.broadcast %cst_5 : f32 to vector<16x1xf32>
    %16 = arith.minimumf %15, %14 : vector<16x1xf32>
    %cst_6 = arith.constant 8.26446266E-5 : f32
    %17 = vector.broadcast %cst_6 : f32 to vector<16x1xf32>
    %18 = arith.mulf %16, %17 : vector<16x1xf32>
    %cst_7 = arith.constant 1.000000e+00 : f32
    %19 = vector.broadcast %cst_7 : f32 to vector<16x1xf32>
    %20 = arith.divf %19, %16 : vector<16x1xf32>
    %21 = arith.addf %18, %20 : vector<16x1xf32>
    %c0_8 = arith.constant 0 : index
    %c0_9 = arith.constant 0 : index
    %22 = vector.load %arg4[%c0_8, %c0_9] : memref<1x1xf32, #tpu.memory_space<vmem>>, vector<1x1xf32>
    %23 = arith.mulf %21, %8 : vector<16x1xf32>
    %24 = vector.shape_cast %23 : vector<16x1xf32> to vector<1x16x1xf32>
    %cst_10 = arith.constant dense<0.000000e+00> : vector<1xf32>
    %25 = vector.multi_reduction <add>, %24, %cst_10 [1, 2] : vector<1x16x1xf32> to vector<1xf32>
    %26 = vector.shape_cast %25 : vector<1xf32> to vector<1x1x1xf32>
    %27 = vector.extract %26[0, 0, 0] : f32 from vector<1x1x1xf32>
    %28 = vector.broadcast %27 : f32 to vector<1x1xf32>
    %29 = arith.addf %22, %28 : vector<1x1xf32>
    %c0_11 = arith.constant 0 : index
    %c0_12 = arith.constant 0 : index
    %30 = vector.load %arg4[%c0_11, %c0_12] : memref<1x1xf32, #tpu.memory_space<vmem>>, vector<1x1xf32>
    tpu.vector_store %arg4[%c0_11, %c0_12], %29 {strides = array<i32>} : memref<1x1xf32, #tpu.memory_space<vmem>>, vector<1x1xf32>,
    %c0_13 = arith.constant 0 : index
    %c0_14 = arith.constant 0 : index
    %31 = vector.load %arg5[%c0_13, %c0_14] : memref<1x1xf32, #tpu.memory_space<vmem>>, vector<1x1xf32>
    %32 = vector.shape_cast %8 : vector<16x1xf32> to vector<1x16x1xf32>
    %cst_15 = arith.constant dense<0.000000e+00> : vector<1xf32>
    %33 = vector.multi_reduction <add>, %32, %cst_15 [1, 2] : vector<1x16x1xf32> to vector<1xf32>
    %34 = vector.shape_cast %33 : vector<1xf32> to vector<1x1x1xf32>
    %35 = vector.extract %34[0, 0, 0] : f32 from vector<1x1x1xf32>
    %36 = vector.broadcast %35 : f32 to vector<1x1xf32>
    %37 = arith.addf %31, %36 : vector<1x1xf32>
    %c0_16 = arith.constant 0 : index
    %c0_17 = arith.constant 0 : index
    %38 = vector.load %arg5[%c0_16, %c0_17] : memref<1x1xf32, #tpu.memory_space<vmem>>, vector<1x1xf32>
    tpu.vector_store %arg5[%c0_16, %c0_17], %37 {strides = array<i32>} : memref<1x1xf32, #tpu.memory_space<vmem>>, vector<1x1xf32>,
    %c0_i32_18 = arith.constant 0 : i32
    %39 = arith.cmpi eq, %arg0, %c0_i32_18 : i32
    %40 = arith.extui %39 : i1 to i32
    %c0_i32_19 = arith.constant 0 : i32
    %41 = arith.cmpi ne, %40, %c0_i32_19 : i32
    scf.if %41 {
      %c0_20 = arith.constant 0 : index
      %c0_21 = arith.constant 0 : index
      %42 = vector.load %arg4[%c0_20, %c0_21] : memref<1x1xf32, #tpu.memory_space<vmem>>, vector<1x1xf32>
      %c0_22 = arith.constant 0 : index
      %c0_23 = arith.constant 0 : index
      %43 = vector.load %arg5[%c0_22, %c0_23] : memref<1x1xf32, #tpu.memory_space<vmem>>, vector<1x1xf32>
      %44 = arith.divf %42, %43 : vector<1x1xf32>
      %c0_24 = arith.constant 0 : index
      %c0_25 = arith.constant 0 : index
      %45 = vector.load %arg3[%c0_24, %c0_25] : memref<1x1xf32, #tpu.memory_space<vmem>>, vector<1x1xf32>
      tpu.vector_store %arg3[%c0_24, %c0_25], %44 {strides = array<i32>} : memref<1x1xf32, #tpu.memory_space<vmem>>, vector<1x1xf32>,
    } else {
    }
    return
  }
  func.func @transform_0(%arg0: i32) -> (i32, i32) {
    %c0_i32 = arith.constant 0 : i32
    %c0_i32_0 = arith.constant 0 : i32
    return %arg0, %c0_i32 : i32, i32
  }
  func.func @transform_1(%arg0: i32) -> (i32, i32) {
    %c0_i32 = arith.constant 0 : i32
    %c0_i32_0 = arith.constant 0 : i32
    return %arg0, %c0_i32 : i32, i32
  }
  func.func @transform_2(%arg0: i32) -> (i32, i32) {
    %c0_i32 = arith.constant 0 : i32
    %c0_i32_0 = arith.constant 0 : i32
    %c0_i32_1 = arith.constant 0 : i32
    return %c0_i32, %c0_i32_0 : i32, i32
  }
}

</mosaic_0001>

<bundles_post_ra>
// kernel: magface_forward.3
= control target key start
LH: loop header
LB: loop body
LE: loop exit
PB: predicated region body
PF: predicated region fallthrough
CT: control target
= control target key end

     0   :  { %vm31_vm0 = vcmask 261120   ;;  %s210_s0 = inlined_call_operand.vmem [shape: f32[16,32], index: 0, kind: input, shape index: {}]   ;;  %s211_s1 = inlined_call_operand.vmem [shape: s32[16,1], index: 1, kind: input, shape index: {}]   ;;  %s212_s2 = inlined_call_operand.hbm [shape: f32[1,1], index: 2, kind: output, shape index: {}]  }
   0x1   :  { %v19_v0 = vld [vmem:[%s210_s0] sm:$0xff]  ;;  %v20_v1 = vld [vmem:[%s210_s0 + $0x8] sm:$0xff] }
   0x2   :  { %7 = vsyncpa [#allocation5], 0  ;;  %v29_v2 = vmul.f32 %v19_v0, %v19_v0  ;;  %v30_v3 = vmul.f32 %v20_v1, %v20_v1  ;;  %v21_v22 = vld [vmem:[%s211_s1] sm:$0xff]  ;;  %v22_v23 = vld [vmem:[%s211_s1 + $0x8] sm:$0xff]  ;;  %v164_v27 = vmov 0.0   ;;  %vm67_vm7 = vcmask 7168  }
   0x3   :  { %vm23_vm5 = vcmp.ne.s32.totalorder %v21_v22, 4294967295  ;;  %vm24_vm6 = vcmp.ne.s32.totalorder %v22_v23, 4294967295  ;;  %vm16_vm8 = vcmask 0   ;;  %s165_s17 = smov [#allocation4]  }
   0x4   :  { %v32_v4 = vsel %vm31_vm0, %v29_v2, 0.0  ;;  %v35_v5 = vsel %vm31_vm0, %v30_v3, 0.0  ;;  %v122_v28 = vsel %vm23_vm5, 1.0, %v164_v27  ;;  %v123_v31 = vsel %vm24_vm6, 1.0, %v164_v27  ;;  %17 = vst.msk [vmem:[#allocation2] sm:$0x1] %vm16_vm8, %v164_v27 }
   0x5   :  { %33 = vadd.xlane.f32.xlu0 %v32_v4  ;;  %v85_v37 = vsel %vm67_vm7, %v122_v28, 0.0  ;;  %v86_v38 = vsel %vm67_vm7, %v123_v31, 0.0  ;;  %18 = vst.msk [vmem:[#allocation3] sm:$0x1] %vm16_vm8, %v164_v27  ;;  %s114_s18 = sshll.u32 %s165_s17, 4  ;;  %s115_s18 = int_to_ptr.vmem [resolvable:$true] %s114_s18 }
   0x6   :  { %v87_v40 = vadd.f32 %v86_v38, %v85_v37  ;;  %s140_s19 = scalar_lea.vmem %s115_s18, 16  ;;  %s144_s20 = scalar_lea.vmem %s115_s18, 32 }
   0x7   :  { %p141_p0 = scmp.ne.s32.totalorder %s115_s18, %s140_s19  ;;  %p145_p1 = scmp.lt.s32.totalorder %s115_s18, %s115_s18 }
   0x8   :  { %p146_p2 = scmp.lt.s32.totalorder %s144_s20, %s140_s19 }
   0x9   :  { %36 = vadd.xlane.f32.xlu0 %v35_v5 }
   0xa   :  { %p147_p3 = por %p146_p2, %p145_p1 }
   0xb   :  { %v64_v55 = vld [vmem:[#allocation2] sm:$0x1] }
   0xc   :  { %v84_v58 = vld [vmem:[#allocation3] sm:$0x1]  ;;  %p148_p4 = pnand %p147_p3, %p141_p0 }
  0x92   :  { %v34_v6 = vpop.xlane.xlu0 %33 }
  0x93   :  { %130 = vrsqrt.f32 %v34_v6  ;;  %vm40_vm1 = vcmp.eq.f32.partialorder %v34_v6, inf  ;;  %v43_v10 = vand.u32 2147483648, %v34_v6  ;;  %vm42_vm2 = vcmp.eq.f32.partialorder %v34_v6, 0.0 }
  0x96   :  { %v37_v7 = vpop.xlane.xlu0 %36 }
  0x97   :  { %132 = vrsqrt.f32 %v37_v7  ;;  %vm47_vm3 = vcmp.eq.f32.partialorder %v37_v7, inf  ;;  %v50_v16 = vand.u32 2147483648, %v37_v7  ;;  %vm49_vm4 = vcmp.eq.f32.partialorder %v37_v7, 0.0 }
  0x9d   :  { %v131_v8 = vpop.eup %130 }
  0x9e   :  { %v39_v9 = vmul.f32 %v131_v8, %v34_v6 }
  0xa0   :  { %v41_v11 = vsel %vm40_vm1, %v34_v6, %v39_v9 }
  0xa1   :  { %v133_v12 = vpop.eup %132  ;;  %v44_v13 = vsel %vm42_vm2, %v43_v10, %v41_v11 }
  0xa2   :  { %v46_v14 = vmul.f32 %v133_v12, %v37_v7  ;;  %v52_v15 = vmax.f32 %v44_v13, 10.0 }
  0xa4   :  { %v48_v17 = vsel %vm47_vm3, %v37_v7, %v46_v14  ;;  %v54_v18 = vmin.f32 %v52_v15, 110.0 }
  0xa5   :  { %v51_v19 = vsel %vm49_vm4, %v50_v16, %v48_v17 }
  0xa6   :  { %v53_v20 = vmax.f32 %v51_v19, 10.0  ;;  %134 = vrcp.f32 %v54_v18  ;;  %v56_v24 = vmul.f32 8.264463e-05, %v54_v18 }
  0xa8   :  { %v55_v21 = vmin.f32 %v53_v20, 110.0 }
  0xaa   :  { %136 = vrcp.f32 %v55_v21  ;;  %v57_v29 = vmul.f32 8.264463e-05, %v55_v21 }
  0xb0   :  { %v135_v25 = vpop.eup %134 }
  0xb1   :  { %v62_v26 = vadd.f32 %v135_v25, %v56_v24 }
  0xb3   :  { %v65_v33 = vmul.f32 %v122_v28, %v62_v26 }
  0xb4   :  { %v137_v30 = vpop.eup %136 }
  0xb5   :  { %v63_v32 = vadd.f32 %v137_v30, %v57_v29  ;;  %v68_v35 = vsel %vm67_vm7, %v65_v33, 0.0 }
  0xb7   :  { %v66_v34 = vmul.f32 %v123_v31, %v63_v32 }
  0xb9   :  { %v69_v36 = vsel %vm67_vm7, %v66_v34, 0.0 }
  0xba   :  { %v70_v39 = vadd.f32 %v69_v36, %v68_v35 }
  0xbc   :  { %71 = vadd.xlane.f32.xlu1 %v70_v39 }
  0xc0   :  { %88 = vadd.xlane.f32.xlu1 %v87_v40 }
 0x149   :  { %v72_v41 = vpop.xlane.xlu1 %71 }
 0x14a   :  { %v73_v42 = vrot.slane %v72_v41, 4 }
 0x14c   :  { %v74_v43 = vadd.f32 %v73_v42, %v72_v41 }
 0x14d   :  { %v89_v44 = vpop.xlane.xlu1 %88 }
 0x14e   :  { %v75_v45 = vrot.slane %v74_v43, 2  ;;  %v90_v46 = vrot.slane %v89_v44, 4 }
 0x150   :  { %v91_v47 = vadd.f32 %v90_v46, %v89_v44  ;;  %v76_v48 = vadd.f32 %v75_v45, %v74_v43 }
 0x152   :  { %v92_v49 = vrot.slane %v91_v47, 2  ;;  %v77_v50 = vrot.slane %v76_v48, 1 }
 0x154   :  { %v93_v51 = vadd.f32 %v92_v49, %v91_v47  ;;  %v78_v52 = vadd.f32 %v77_v50, %v76_v48 }
 0x156   :  { %124 = vpush %v78_v52  ;;  %v94_v53 = vrot.slane %v93_v51, 1 }
 0x158   :  { %v95_v54 = vadd.f32 %v94_v53, %v93_v51 }
 0x15a   :  { %126 = vpush %v95_v54 }
 0x187   :  { %s125_s1 = spop %124 }
 0x188   :  { %v80_v56 = vstv %s125_s1 }
 0x189   :  { %v81_v57 = vadd.f32 %v80_v56, %v64_v55 }
 0x18b   :  { %83 = vst.msk [vmem:[#allocation2] sm:$0x1] %vm16_vm8, %v81_v57  ;;  %s127_s16 = spop %126 }
 0x18c   :  { %v97_v59 = vstv %s127_s16 }
 0x18d   :  { %v98_v60 = vadd.f32 %v97_v59, %v84_v58 }
 0x18f   :  { %99 = vst.msk [vmem:[#allocation3] sm:$0x1] %vm16_vm8, %v98_v60 }
 0x192   :  { %v103_v63 = vld [vmem:[#allocation2] sm:$0x1] }
 0x196   :  { %v104_v61 = vld [vmem:[#allocation3] sm:$0x1] }
 0x197   :  { %138 = vrcp.f32 %v104_v61 }
 0x1a1   :  { %v139_v62 = vpop.eup %138 }
 0x1a2   :  { %v106_v0 = vmul.f32 %v139_v62, %v103_v63 }
 0x1a4   :  { %107 = vst.msk [vmem:[#allocation4] sm:$0x1] %vm16_vm8, %v106_v0 }
 0x1a5   :  { %151 = shalt.err (!%p148_p4)
}
 0x1a6   :  { %s152_s23 = scalar_lea.hbm %s212_s2, 16 }
 0x1a7   :  { %p153_p5 = scmp.ne.s32.totalorder %s212_s2, %s152_s23  ;;  %p156_p6 = scmp.lt.u32.totalorder %s152_s23, %s212_s2 }
 0x1a9   :  { %p158_p7 = pnand %p156_p6, %p153_p5 }
 0x1ab   :  { %161 = shalt.err (!%p158_p7)
}
 0x1ac   :  { %117 = dma.vmem_to_hbm [thread:$0]  %s115_s18, 16, %s212_s2, [#allocation5]  }
 0x1ad   :  { %162 = dma.done.wait [#allocation5], 16  }
 0x1ae   :  { %163 = vsyncadd [#allocation5], 4294967280 }
 0x1af   :  { %121 = vsyncpa [#allocation5], 1 }

// kernel: magface_forward.2
= control target key start
LH: loop header
LB: loop body
LE: loop exit
PB: predicated region body
PF: predicated region fallthrough
CT: control target
= control target key end

     0   :  { %8 = vsyncpa [#allocation3], 0  ;;  %s1152_s0 = inlined_call_operand.hbm [shape: f32[16,256], index: 0, kind: input, shape index: {}, may-alias: {0,3}]   ;;  %s1153_s1 = inlined_call_operand.vmem [shape: s32[16,1], index: 1, kind: input, shape index: {}]   ;;  %s1154_s2 = inlined_call_operand.vmem [shape: f32[16,32], index: 2, kind: input, shape index: {}]   ;;  %s1155_s3 = inlined_call_operand.hbm [shape: f32[16,256], index: 3, kind: output, shape index: {}, may-alias: {0,3}]  }
   0x1   :  { %10 = vsyncpa [#allocation3 + $0x1], 0 }
   0x2   :  { %11 = vsyncpa [#allocation4], 0 }
   0x3   :  { %13 = vsyncpa [#allocation4 + $0x1], 0  ;;  %s909_s12 = smov 0   ;;  %s911_s13 = smov 0  }
   0x4   :  { %s913_s14 = smov 0   ;;  %s915_s15 = smov 0  }
   0x5   :  { %s917_s16 = smov 0   ;;  %s919_s17 = smov 0  }
   0x6   :  { %s921_s18 = smov 0   ;;  %s923_s19 = smov 0  }
   0x7 LB: > { %s624_s20 = sadd.s32 4294967295, %s878_s19   ;;  %s625_s21 = sadd.s32 4294967294, %s878_s19   ;;  %s878_s19 = sphi %s923_s19, %s19_s19   ;;  %s874_s18 = sphi %s921_s18, %s1174_s18   ;;  %s870_s17 = sphi %s919_s17, %s1173_s17   ;;  %s866_s16 = sphi %s917_s16, %s1172_s16   ;;  %s862_s15 = sphi %s915_s15, %s1171_s15   ;;  %s858_s14 = sphi %s913_s14, %s1170_s14   ;;  %s854_s13 = sphi %s911_s13, %s1169_s13   ;;  %s850_s12 = sphi %s909_s12, %s1168_s12  }
   0x8   : > { %s28_s22 = sadd.s32 1, %s870_s17  ;;  %s31_s23 = sadd.s32 1, %s874_s18 }
   0x9   : > { %p29_p0 = scmp.ge.s32.totalorder %s28_s22, 2  ;;  %s40_s24 = sadd.s32 1, %s858_s14 }
   0xa   : > { %p47_p1 = scmp.ne.s32.totalorder %s858_s14, %s854_s13  ;;  %p48_p2 = scmp.eq.s32.totalorder %s878_s19, 0 }
   0xb   : > { %s1176_s22 = smov (%p29_p0, %s28_s22), 0  ;;  %s1178_s23 = smov (!%p29_p0, %s31_s23), %s874_s18 }
   0xc   : > { %s36_s25 = ssub.s32 %s870_s17, %s1176_s22  ;;  %p962_p3 = por %p48_p2, %p47_p1 }
   0xd   : > { %p33_p4 = scmp.ge.s32.totalorder %s1178_s23, 2  ;;  %p53_p5 = scmp.ne.s32.totalorder %s854_s13, %s850_s12 }
   0xe   : > { %p54_p6 = scmp.eq.s32.totalorder %s624_s20, 0  ;;  %p131_p7 = scmp.eq.s32.totalorder %s624_s20, 3 }
   0xf   : > { %s1180_s23 = smov (%p33_p4, %s1178_s23), 0  ;;  %p137_p10 = scmp.eq.s32.totalorder %s625_s21, 3 }
  0x10   : > { %p970_p8 = por %p54_p6, %p53_p5  ;;  %p974_p9 = por %p131_p7, %p47_p1 }
  0x11   : > { %s35_s29 = ssub.s32 %s874_s18, %s1180_s23  ;;  %p980_p12 = por %p137_p10, %p53_p5 }
  0x12   : > { %s1159_s28 = scalar_select %p974_p9, 1, 0 }
  0x13   : > { %s37_s30 = sor.u32 %s36_s25, %s35_s29  ;;  %p667_p13 = scmp.lt.s32.totalorder %s878_s19, 4 }
  0x14   : > { %p38_p11 = scmp.eq.s32.totalorder %s37_s30, 0  ;;  %s157_s5 = sand.u32 1, %s858_s14  }
  0x15   : > { %s1160_s4 = scalar_select %p980_p12, 1, 0 }
  0x16   : > { %s987_s6 = scalar_select %p38_p11, %s858_s14, %s40_s24  }
  0x17   : > { %s628_s7 = sshll.u32 %s157_s5, 3  ;;  %s629_s8 = sshll.u32 %s874_s18, 1 }
  0x18   : > { %s166_s9 = sadd.s32 %s870_s17, %s629_s8  ;;  %s161_s10 = scalar_lea.vmem [#allocation2], %s628_s7 }
  0x19   : > { %s170_s11 = sshll.u32 %s161_s10, 4  ;;  %s630_s20 = sshll.u32 %s166_s9, 7  ;;  %s991_s11 = int_to_ptr.vmem [resolvable:$true] %s170_s11 }
  0x1a   : > { %s996_s29 = scalar_lea.hbm %s1152_s0, %s630_s20  ;;  %p1000_p0 = pnand %p667_p13, %p962_p3 }
  0x1b   : > { %s158_s30 = scalar_lea.sflag [#allocation3], %s157_s5  ;;  %s750_s7 = scalar_lea.hbm %s996_s29, 128 }
  0x1c   : > { %p751_p4 = scmp.ne.s32.totalorder %s996_s29, %s750_s7  ;;  %p752_p5 = pneg %p1000_p0 }
  0x1d   : > { %s755_s9 = scalar_lea.hbm %s1152_s0, 512  ;;  %p756_p3 = scmp.lt.u32.totalorder %s996_s29, %s1152_s0 }
  0x1e   : > { %p753_p6 = pnand %p752_p5, %p751_p4  ;;  %p757_p10 = scmp.lt.u32.totalorder %s755_s9, %s750_s7 }
  0x1f   : > { %p759_p13 = scmp.lt.u32.totalorder %s750_s7, %s996_s29 }
  0x20   : > { %p754_p7 = pneg %p753_p6  ;;  %p758_p11 = por %p757_p10, %p756_p3 }
  0x22   : > { %p760_p1 = por %p759_p13, %p758_p11 }
  0x24   : > { %p761_p2 = pnand %p760_p1, %p754_p7 }
  0x26   : > { %764 = shalt.err (!%p761_p2)
}
  0x27   : > { %s765_s5 = scalar_lea.vmem %s991_s11, 128  ;;  %s880_s21 = smov [#allocation2]  }
  0x28   : > { %p766_p4 = scmp.ne.s32.totalorder %s991_s11, %s765_s5  ;;  %s770_s25 = sshll.u32 %s880_s21, 4  ;;  %s771_s25 = int_to_ptr.vmem [resolvable:$false] %s770_s25 }
  0x29   : > { %s772_s26 = scalar_lea.vmem %s771_s25, 256  ;;  %p773_p9 = scmp.lt.s32.totalorder %s991_s11, %s771_s25 }
  0x2a   : > { %p768_p6 = pnand %p766_p4, %p752_p5  ;;  %p774_p3 = scmp.lt.s32.totalorder %s772_s26, %s765_s5 }
  0x2c   : > { %p769_p12 = pneg %p768_p6  ;;  %p775_p10 = por %p774_p3, %p773_p9 }
  0x2e   : > { %p776_p11 = pnand %p775_p10, %p769_p12 }
  0x30   : > { %779 = shalt.err (!%p776_p11)
}
  0x31   : > { %662 = dma.hbm_to_vmem [thread:$0]  (!%p1000_p0), %s996_s29, 128, %s991_s11, %s158_s30  }
  0x32   : > { %p1162_p1 = scmp.lt.s32.totalorder %s878_s19, 5  ;;  %p1163_p2 = scmp.ge.s32.totalorder %s878_s19, 1 }
  0x34   : > { %p190_p5 = pnand %p1163_p2, %p1162_p1 }
  0x35   : > { %s1036_s7 = sand.u32 (!%p190_p5), 1, %s854_s13  }
  0x36   : > { %193 = sbr.rel (%p190_p5) target bundleno = 407 (0x197), region = 32  ;;  %s632_s8 = sshll.u32 (!%p190_p5), %s1036_s7, 3 }
  0x37   : > { %s196_s9 = scalar_lea.sflag (!%p190_p5), [#allocation3], %s1036_s7  ;;  %s1042_s24 = scalar_lea.vmem (!%p190_p5), [#allocation2], %s632_s8 }
  0x3d   : > { %841 = dma.done.wait (%p970_p8), %s196_s9, 128  }
  0x3e   : > { %843 = vsyncadd (%p970_p8), %s196_s9, 4294967168  ;;  %p230_p9 = scmp.lt.s32.totalorder %s866_s16, 1  ;;  %v881_v0 = vmov 0   ;;  %vm243_vm0 = vcmask 261120   ;;  %v466_v6 = vlaneseq  ;;  %s645_s27 = sshll.u32 %s862_s15, 7  ;;  %v1058_v13 = vld [vmem:[%s1042_s24] sm:$0xff] }
  0x3f   : > { %741 = vset.pattern.permute.xlu1 %v881_v0  ;;  %740 = vset.pattern.permute.xlu0 %v881_v0  ;;  %v469_v9 = vstv %s645_s27  ;;  %v882_v36 = vmov 683565275   ;;  %v883_v38 = vmov 2475754826   ;;  %v884_v41 = vmov 2131351028  }
  0x40   : > { %s231_s11 = scalar_select %p230_p9, %s866_s16, 1  ;;  %v467_v8 = vand.u32 127, %v466_v6  ;;  %v885_v44 = vmov 2102212464   ;;  %v886_v47 = vmov 920167782  }
  0x41   : > { %v887_v50 = vmov 1326507024   ;;  %s647_s26 = sshll.u32 %s866_s16, 1  ;;  %p1166_p12 = scmp.ne.s32.totalorder %s1159_s28, 0 }
  0x42   : > { %s634_s29 = sshll.u32 %s231_s11, 3  ;;  %v470_v11 = vadd.s32 %v469_v9, %v467_v8  ;;  %s511_s9 = sadd.s32 %s862_s15, %s647_s26 }
  0x43   : > { %s237_s20 = scalar_lea.vmem %s1154_s2, %s634_s29  ;;  %s233_s25 = scalar_lea.vmem %s1153_s1, %s634_s29 }
  0x44   : > { %v240_v1 = vld [vmem:[%s237_s20] sm:$0xff]  ;;  %s648_s24 = sshll.u32 %s511_s9, 7  ;;  %s229_s11 = scalar_lea.vmem [#allocation5], %s632_s8 }
  0x45   : > { %v239_v2 = vld [vmem:[%s233_s25] sm:$0xff]  ;;  %v242_v3 = vmul.f32 %v240_v1, %v240_v1  ;;  %s515_s29 = sshll.u32 %s229_s11, 4  ;;  %s1098_s10 = scalar_lea.hbm %s1155_s3, %s648_s24  ;;  %s1100_s29 = int_to_ptr.vmem [resolvable:$true] %s515_s29 }
  0x46   : > { %vm241_vm1 = vcmp.ne.s32.totalorder %v239_v2, 4294967295  ;;  %s500_s15 = scalar_lea.sflag [#allocation4], %s1036_s7  ;;  %s780_s20 = scalar_lea.vmem %s1100_s29, 128 }
  0x47   : > { %v475_v4 = vsel %vm241_vm1, 1, %v881_v0  ;;  %v244_v5 = vsel %vm243_vm0, %v242_v3, 0.0  ;;  %p781_p8 = scmp.ne.s32.totalorder %s1100_s29, %s780_s20  ;;  %s888_s8 = smov [#allocation5]  }
  0x48   : > { %477 = vperm.xlu1 %741, %v475_v4   ;;  %245 = vadd.xlane.f32.xlu0 %v244_v5  ;;  %s784_s5 = sshll.u32 %s888_s8, 4  ;;  %s785_s5 = int_to_ptr.vmem [resolvable:$false] %s784_s5 }
  0x49   : > { %p782_p0 = pnand %p781_p8, %p1166_p12  ;;  %s786_s21 = scalar_lea.vmem %s785_s5, 256 }
  0x4a   : > { %p787_p13 = scmp.lt.s32.totalorder %s1100_s29, %s785_s5  ;;  %p788_p4 = scmp.lt.s32.totalorder %s786_s21, %s780_s20 }
  0x4b   : > { %p783_p7 = pneg %p782_p0 }
  0x4c   : > { %p789_p6 = por %p788_p4, %p787_p13 }
  0x4e   : > { %p790_p3 = pnand %p789_p6, %p783_p7 }
  0x5e   : > { %472 = vperm.xlu0 %740, %v239_v2  }
  0xc7   : > { %v478_v10 = vpop.permute.xlu1 %477 }
  0xc8   : > { %vm479_vm2 = vcmp.eq.s32.totalorder %v478_v10, 1 }
  0xd5   : > { %v246_v7 = vpop.xlane.xlu0 %245 }
  0xd6   : > { %742 = vrsqrt.f32 %v246_v7  ;;  %vm249_vm5 = vcmp.eq.f32.partialorder %v246_v7, inf  ;;  %v252_v18 = vand.u32 2147483648, %v246_v7  ;;  %vm251_vm6 = vcmp.eq.f32.partialorder %v246_v7, 0.0 }
  0xdd   : > { %v473_v12 = vpop.permute.xlu0 %472 }
  0xde   : > { %vm474_vm3 = vcmp.eq.s32.totalorder %v470_v11, %v473_v12 }
  0xdf   : > { %vm1060_vm4 = vmand %vm474_vm3, %vm479_vm2 }
  0xe0   : > { %v743_v15 = vpop.eup %742  ;;  %v481_v16 = vsel %vm1060_vm4, %v1058_v13, 0.0 }
  0xe1   : > { %v248_v17 = vmul.f32 %v743_v15, %v246_v7  ;;  %482 = vadd.xlane.f32.xlu1 %v481_v16 }
  0xe3   : > { %v250_v19 = vsel %vm249_vm5, %v246_v7, %v248_v17 }
  0xe4   : > { %v253_v20 = vsel %vm251_vm6, %v252_v18, %v250_v19 }
  0xe5   : > { %v254_v21 = vmax.f32 %v253_v20, 10.0 }
  0xe7   : > { %v255_v22 = vmin.f32 %v254_v21, 110.0 }
  0xe9   : > { %v636_v23 = vadd.f32 -10.0, %v255_v22 }
  0xeb   : > { %v257_v24 = vmul.f32 0.0035, %v636_v23 }
  0xed   : > { %v1067_v25 = vadd.f32 0.45, %v257_v24 }
  0xef   : > { %v262_v26 = vand.u32 2139095040, %v1067_v25  ;;  %v259_v30 = vand.u32 2147483647, %v1067_v25  ;;  %vm261_vm14 = vcmp.lt.s32.totalorder %v1067_v25, 0 }
  0xf1   : > { %v263_v27 = vshrl.u32 %v262_v26, 23  ;;  %v266_v33 = vand.u32 8388607, %v259_v30  ;;  %vm260_vm15 = vcmp.le.f32.partialorder %v259_v30, 0.7853982 }
  0xf3   : > { %v637_v28 = vadd.s32 4294967169, %v263_v27  ;;  %v267_v52 = vor.u32 8388608, %v266_v33 }
  0xf5   : > { %v269_v29 = vadd.s32 1, %v637_v28  ;;  %v307_v2 = vshll.u32 %v267_v52, 8 }
  0xf7   : > { %vm270_vm7 = vcmp.gt.s32.totalorder %v269_v29, 0 }
  0xf8   : > { %v271_v31 = vsel %vm270_vm7, %v269_v29, 0  ;;  %vm351_vm7 = vweird.f32 %v1067_v25 }
  0xf9   : > { %v273_v32 = vand.u32 31, %v271_v31  ;;  %v272_v35 = vshrl.u32 %v271_v31, 5 }
  0xfb   : > { %v274_v34 = vsub.s32 32, %v273_v32  ;;  %v276_v37 = vshll.u32 %v882_v36, %v273_v32  ;;  %v279_v39 = vshll.u32 %v883_v38, %v273_v32  ;;  %v282_v43 = vshll.u32 %v884_v41, %v273_v32 }
  0xfc   : > { %v285_v46 = vshll.u32 %v885_v44, %v273_v32  ;;  %v288_v49 = vshll.u32 %v886_v47, %v273_v32  ;;  %vm291_vm8 = vcmp.lt.s32.totalorder %v272_v35, 1  ;;  %vm294_vm9 = vcmp.lt.s32.totalorder %v272_v35, 4 }
  0xfd   : > { %v277_v40 = vshrl.u32 %v883_v38, %v274_v34  ;;  %v280_v42 = vshrl.u32 %v884_v41, %v274_v34  ;;  %v283_v45 = vshrl.u32 %v885_v44, %v274_v34  ;;  %v286_v48 = vshrl.u32 %v886_v47, %v274_v34 }
  0xfe   : > { %v289_v51 = vshrl.u32 %v887_v50, %v274_v34  ;;  %v275_v61 = vshrl.u32 %v882_v36, %v274_v34  ;;  %vm293_vm10 = vcmp.lt.s32.totalorder %v272_v35, 3  ;;  %vm292_vm11 = vcmp.lt.s32.totalorder %v272_v35, 2 }
  0xff   : > { %v278_v53 = vor.u32 %v277_v40, %v276_v37  ;;  %v281_v54 = vor.u32 %v280_v42, %v279_v39  ;;  %v284_v55 = vor.u32 %v283_v45, %v282_v43  ;;  %v287_v56 = vor.u32 %v286_v48, %v285_v46 }
 0x100   : > { %v290_v57 = vor.u32 %v289_v51, %v288_v49 }
 0x101   : > { %v296_v58 = vsel %vm294_vm9, %v284_v55, 2102212464  ;;  %v299_v59 = vsel %vm291_vm8, %v278_v53, %v281_v54  ;;  %v303_v60 = vsel %vm291_vm8, %v281_v54, %v284_v55  ;;  %v300_v62 = vsel %vm294_vm9, %v287_v56, 920167782 }
 0x102   : > { %v304_v63 = vsel %vm294_vm9, %v290_v57, 1326507024  ;;  %v301_v0 = vsel %vm293_vm10, %v284_v55, %v300_v62  ;;  %v295_v3 = vsel %vm291_vm8, %v275_v61, %v278_v53  ;;  %v297_v4 = vsel %vm293_vm10, %v281_v54, %v296_v58 }
 0x103   : > { %v305_v1 = vsel %vm293_vm10, %v287_v56, %v304_v63  ;;  %v302_v5 = vsel %vm292_vm11, %v299_v59, %v301_v0  ;;  %v298_v11 = vsel %vm292_vm11, %v295_v3, %v297_v4 }
 0x104   : > { %v306_v6 = vsel %vm292_vm11, %v303_v60, %v305_v1  ;;  %v1076_v9 = vmul.u32.u64.low %v307_v2, %v302_v5  ;;  %v1077_v10 = vmul.u32.u64.high %v307_v2, %v302_v5, %v1076_v9  ;;  %v314_v15 = vmul.u32 %v307_v2, %v298_v11 }
 0x105   : > { %v1073_v7 = vmul.u32.u64.low %v307_v2, %v306_v6  ;;  %v1074_v8 = vmul.u32.u64.high %v307_v2, %v306_v6, %v1073_v7 }
 0x106   : > { %v317_v12 = vadd.s32 1, %v1077_v10 }
 0x107   : > { %vm316_vm12 = vc.u32 %v1074_v8, %v1076_v9  ;;  %v315_v28 = vadd.s32 %v1076_v9, %v1074_v8 }
 0x108   : > { %v318_v16 = vsel %vm316_vm12, %v317_v12, %v1077_v10 }
 0x109   : > { %v319_v17 = vadd.s32 %v318_v16, %v314_v15 }
 0x10b   : > { %v320_v18 = vadd.s32 536870912, %v319_v17 }
 0x10d   : > { %v321_v19 = vshrl.u32 %v320_v18, 30 }
 0x10f   : > { %v322_v20 = vshll.u32 %v321_v19, 30  ;;  %v345_v41 = vsub.s32 4, %v321_v19 }
 0x111   : > { %v323_v21 = vsub.s32 %v319_v17, %v322_v20  ;;  %v346_v44 = vsel %vm261_vm14, %v345_v41, %v321_v19 }
 0x112   : > { %v348_v46 = vsel %vm260_vm15, 0, %v346_v44 }
 0x113   : > { %v325_v22 = vsub.s32 0, %v323_v21  ;;  %v455_v47 = vadd.s32 3, %v348_v46  ;;  %v352_v48 = vand.u32 3, %v348_v46 }
 0x115   : > { %v638_v23 = vmin.u32 %v325_v22, %v323_v21  ;;  %v456_v49 = vand.u32 3, %v455_v47  ;;  %vm357_vm0 = vcmp.eq.s32.totalorder %v352_v48, 2  ;;  %vm354_vm2 = vcmp.eq.s32.totalorder %v352_v48, 0 }
 0x116   : > { %vm353_vm5 = vcmp.lt.s32.totalorder %v352_v48, 2 }
 0x117   : > { %v327_v24 = vclz %v638_v23  ;;  %vm461_vm1 = vcmp.eq.s32.totalorder %v456_v49, 2  ;;  %vm458_vm3 = vcmp.eq.s32.totalorder %v456_v49, 0  ;;  %vm457_vm6 = vcmp.lt.s32.totalorder %v456_v49, 2 }
 0x119   : > { %v639_v26 = vadd.s32 4294967294, %v327_v24 }
 0x11b   : > { %vm640_vm13 = vcmp.lt.s32.totalorder %v639_v26, 0 }
 0x11c   : > { %v330_v27 = vsel %vm640_vm13, 0, %v639_v26 }
 0x11d   : > { %v331_v29 = vsub.s32 32, %v330_v27  ;;  %v335_v31 = vsub.s32 4294967266, %v330_v27  ;;  %v332_v32 = vshll.u32 %v323_v21, %v330_v27 }
 0x11f   : > { %v333_v33 = vshrl.u32 %v315_v28, %v331_v29  ;;  %v336_v34 = vadd.s32 127, %v335_v31 }
 0x121   : > { %v334_v35 = vor.u32 %v333_v33, %v332_v32  ;;  %v337_v36 = vshll.u32 %v336_v34, 23 }
 0x123   : > { %v338_v37 = vor.u32 4788187, %v337_v36  ;;  %v341_v39 = vcvt.s32.f32 %v334_v35 }
 0x125   : > { %v339_v38 = vand.u32 2147483647, %v338_v37 }
 0x127   : > { %v342_v40 = vmul.f32 %v341_v39, %v339_v38 }
 0x129   : > { %v343_v42 = vxor.u32 2147483648, %v342_v40 }
 0x12b   : > { %v344_v43 = vsel %vm261_vm14, %v343_v42, %v342_v40 }
 0x12c   : > { %v347_v45 = vsel %vm260_vm15, %v1067_v25, %v344_v43 }
 0x12d   : > { %744 = vcosq.f32 %v347_v45 }
 0x12e   : > { %746 = vsinq.f32 %v347_v45 }
 0x137   : > { %v745_v50 = vpop.eup %744 }
 0x138   : > { %v747_v51 = vpop.eup %746  ;;  %v358_v52 = vxor.u32 2147483648, %v745_v50 }
 0x139   : > { %v355_v53 = vxor.u32 2147483648, %v747_v51 }
 0x13a   : > { %v359_v54 = vsel %vm357_vm0, %v358_v52, %v747_v51  ;;  %v463_v30 = vsel %vm461_vm1, %v358_v52, %v747_v51 }
 0x13b   : > { %v356_v55 = vsel %vm354_vm2, %v745_v50, %v355_v53  ;;  %v460_v56 = vsel %vm458_vm3, %v745_v50, %v355_v53 }
 0x13c   : > { %v360_v57 = vsel %vm353_vm5, %v356_v55, %v359_v54  ;;  %v464_v58 = vsel %vm457_vm6, %v460_v56, %v463_v30 }
 0x13d   : > { %v361_v59 = vsel %vm351_vm7, nan, %v360_v57  ;;  %v465_v60 = vsel %vm351_vm7, nan, %v464_v58 }
 0x16e   : > { %v483_v61 = vpop.xlane.xlu1 %482 }
 0x16f   : > { %v484_v62 = vmul.f32 %v483_v61, %v483_v61  ;;  %v493_v25 = vmul.f32 %v483_v61, %v361_v59 }
 0x171   : > { %v485_v63 = vsub.f32 1.0, %v484_v62 }
 0x173   : > { %748 = vrsqrt.f32 %v485_v63  ;;  %vm488_vm8 = vcmp.eq.f32.partialorder %v485_v63, inf  ;;  %v491_v2 = vand.u32 2147483648, %v485_v63  ;;  %vm490_vm9 = vcmp.eq.f32.partialorder %v485_v63, 0.0 }
 0x17d   : > { %v749_v0 = vpop.eup %748 }
 0x17e   : > { %v487_v1 = vmul.f32 %v749_v0, %v485_v63 }
 0x180   : > { %v489_v3 = vsel %vm488_vm8, %v485_v63, %v487_v1 }
 0x181   : > { %v492_v4 = vsel %vm490_vm9, %v491_v2, %v489_v3 }
 0x182   : > { %v494_v5 = vmul.f32 %v492_v4, %v465_v60 }
 0x184   : > { %v495_v6 = vsub.f32 %v493_v25, %v494_v5 }
 0x186   : > { %v496_v7 = vsel %vm1060_vm4, %v495_v6, %v1058_v13 }
 0x187   : > { %v497_v8 = vmul.f32 64.0, %v496_v7 }
 0x189   : > { %498 = vst [vmem:[%s229_s11] sm:$0xff] %v497_v8 }
 0x18a   : > { %793 = shalt.err (!%p790_p3)
}
 0x18b   : > { %s794_s7 = scalar_lea.hbm %s1098_s10, 128  ;;  %s798_s26 = scalar_lea.hbm %s1155_s3, 512 }
 0x18c   : > { %p795_p10 = scmp.ne.s32.totalorder %s1098_s10, %s794_s7  ;;  %p799_p2 = scmp.lt.u32.totalorder %s1098_s10, %s1155_s3 }
 0x18d   : > { %p800_p5 = scmp.lt.u32.totalorder %s798_s26, %s794_s7  ;;  %p802_p8 = scmp.lt.u32.totalorder %s794_s7, %s1098_s10 }
 0x18e   : > { %p796_p11 = pnand %p795_p10, %p1166_p12 }
 0x18f   : > { %p801_p9 = por %p800_p5, %p799_p2 }
 0x190   : > { %p797_p1 = pneg %p796_p11 }
 0x191   : > { %p803_p0 = por %p802_p8, %p801_p9 }
 0x193   : > { %p804_p7 = pnand %p803_p0, %p797_p1 }
 0x195   : > { %807 = shalt.err (!%p804_p7)
}
 0x196   : > { %657 = dma.vmem_to_hbm [thread:$0]  (%p1166_p12), %s1100_s29, 128, %s1098_s10, %s500_s15  }
 0x197 PF: > { %p668_p13 = scmp.ge.s32.totalorder %s878_s19, 2  ;;  %s527_s11 = sand.u32 1, %s850_s12  }
 0x198   : > { %p1167_p4 = scmp.ne.s32.totalorder %s1160_s4, 0  ;;  %s528_s16 = scalar_lea.sflag [#allocation4], %s527_s11 }
 0x19a   : > { %p664_p6 = pnand %p668_p13, %p1167_p4 }
 0x19c   : > { %845 = dma.done.wait (!%p664_p6), %s528_s16, 128  }
 0x19d   : > { %847 = vsyncadd (!%p664_p6), %s528_s16, 4294967168  ;;  %s19_s19 = sadd.s32 1, %s878_s19   ;;  %s1168_s12 = smov %s854_s13 }
 0x19e   : > { %p16_p3 = scmp.ge.s32.totalorder %s19_s19, 6   ;;  %s1169_s13 = smov %s858_s14 }
 0x19f   : > { %s1170_s14 = smov %s987_s6  ;;  %s1171_s15 = smov %s870_s17 }
 0x1a0   : > { %s1172_s16 = smov %s874_s18  ;;  %s1173_s17 = smov %s1176_s22 }
 0x1a1   : > { %s1174_s18 = smov %s1180_s23  ;;  %18 = sbr.rel (!%p16_p3) target bundleno = 7 (0x7), region = 83 }
 0x1a8   :  { %533 = vsyncpa [#allocation3], 1 }
 0x1a9   :  { %535 = vsyncpa [#allocation3 + $0x1], 1 }
 0x1aa   :  { %536 = vsyncpa [#allocation4], 1 }
 0x1ab   :  { %538 = vsyncpa [#allocation4 + $0x1], 1 }

</bundles_post_ra>
